<compile_context>
chip_gen: v7x
topology: tpu7x:2x2x1
jax: 0.10.0
libtpu: 0.0.40
codegen_flags: <defaults>
</compile_context>

<pallas_src>
import functools

import jax
import jax.numpy as jnp
from jax import lax
from jax.experimental import pallas as pl
from jax.experimental.pallas import tpu as pltpu

_LANES = 128
_SUBLANES = 8


def _round_up(x, m):
    return ((x + m - 1) // m) * m


def _focal_loss_kernel(n_ref, yp_ref, yt_ref, pos_out_ref, foc_out_ref,
                       acc_pos, acc_foc, *, gamma, block_rows, tiles_per_chunk):
    c = pl.program_id(0)            # "parallel" chunk axis (megacore on v7x)
    t = pl.program_id(1)            # sequential reduction tiles within the chunk
    nt = pl.num_programs(1)

    @pl.when(t == 0)
    def _init():
        acc_pos[...] = jnp.zeros_like(acc_pos)
        acc_foc[...] = jnp.zeros_like(acc_foc)

    x = yp_ref[...].astype(jnp.float32)        # (block_rows, 128) logits
    y_f = yt_ref[...].astype(jnp.float32)      # float labels, used by BCE (as in torch)
    y_i = yt_ref[...].astype(jnp.int32)        # mirrors torch's y_true.long() gather index

    # Mask out zero-padding (global flat index >= n_valid).
    n_valid = n_ref[0]
    row0 = (c * tiles_per_chunk + t) * block_rows
    row = row0 + lax.broadcasted_iota(jnp.int32, x.shape, 0)
    lane = lax.broadcasted_iota(jnp.int32, x.shape, 1)
    valid = (row * _LANES + lane) < n_valid

    # binary_cross_entropy_with_logits, reduction='none' (stable form), sharing e.
    ax = jnp.abs(x)
    e = jnp.exp(-ax)                            # single exp per element
    bce = jnp.maximum(x, 0.0) - x * y_f + jnp.log1p(e)

    # pt = exp(-BCE) == sigmoid(x) if y==1 else 1-sigmoid(x) for binary labels,
    # so reuse e instead of a second exp.
    r = pl.reciprocal(1.0 + e, approx=True)
    p1 = jnp.where(x >= 0.0, r, e * r)          # sigmoid(x)
    is_pos = y_i == 1
    pt = jnp.where(is_pos, p1, 1.0 - p1)

    one_m_pt = 1.0 - pt
    if gamma == 2.0:
        mod = one_m_pt * one_m_pt               # avoid pow -> exp+log on the EUP
    elif gamma == 1.0:
        mod = one_m_pt
    elif gamma == 0.0:
        mod = jnp.ones_like(one_m_pt)
    else:
        mod = jnp.power(one_m_pt, jnp.float32(gamma))
    focal = mod * bce

    # Accumulate per-lane partials into (8,128) scratch; the (block_rows,128) ->
    # (8,128) fold is pure vector adds over the leading axis (no XLU work).
    shape3 = (block_rows // _SUBLANES, _SUBLANES, _LANES)
    acc_foc[...] += jnp.where(valid, focal, 0.0).reshape(shape3).sum(axis=0)
    acc_pos[...] += jnp.where(jnp.logical_and(valid, is_pos), 1.0, 0.0) \
        .reshape(shape3).sum(axis=0)

    @pl.when(t == nt - 1)
    def _finalize():
        pos_out_ref[0] = acc_pos[...]
        foc_out_ref[0] = acc_foc[...]


def focal_loss_pallas(y_pred, y_true, alpha=0.25, gamma=2.0,
                      block_rows=512, num_chunks=2):
    # check_tensor_shape(..., (-1, 1)) -> flatten to a single column.
    yp = jnp.reshape(y_pred, (-1,))
    yt = jnp.reshape(y_true, (-1,))
    n = yp.shape[0]

    rows = pl.cdiv(n, _LANES)
    tr = min(int(block_rows), _round_up(pl.cdiv(rows, num_chunks), _SUBLANES))
    tr = max(tr, _SUBLANES)
    tiles_per_chunk = pl.cdiv(rows, num_chunks * tr)
    rows_pad = num_chunks * tiles_per_chunk * tr
    npad = rows_pad * _LANES

    # Keep original dtype (cast happens in-kernel); only pad when the shape requires it.
    # TODO(synk): handle the ragged tail fully in-kernel to avoid this full-array pad
    # copy when N is not already aligned to the padded bucket.
    if npad != n:
        yp = jnp.pad(yp, (0, npad - n))
        yt = jnp.pad(yt, (0, npad - n))
    yp = yp.reshape(rows_pad, _LANES)
    yt = yt.reshape(rows_pad, _LANES)

    n_arr = jnp.array([n], dtype=jnp.int32)     # scalar-prefetch: no recompile per N bucket

    in_block = lambda c, t, n_ref: (c * tiles_per_chunk + t, 0)
    out_block = lambda c, t, n_ref: (c, 0, 0)

    out_shape = (
        jax.ShapeDtypeStruct((num_chunks, _SUBLANES, _LANES), jnp.float32),
        jax.ShapeDtypeStruct((num_chunks, _SUBLANES, _LANES), jnp.float32),
    )

    pos_part, foc_part = pl.pallas_call(
        functools.partial(_focal_loss_kernel, gamma=float(gamma),
                          block_rows=tr, tiles_per_chunk=tiles_per_chunk),
        out_shape=out_shape,
        grid_spec=pltpu.PrefetchScalarGridSpec(
            num_scalar_prefetch=1,
            grid=(num_chunks, tiles_per_chunk),
            in_specs=[pl.BlockSpec((tr, _LANES), in_block),
                      pl.BlockSpec((tr, _LANES), in_block)],
            out_specs=[pl.BlockSpec((1, _SUBLANES, _LANES), out_block),
                       pl.BlockSpec((1, _SUBLANES, _LANES), out_block)],
            scratch_shapes=[pltpu.VMEM((_SUBLANES, _LANES), jnp.float32),
                            pltpu.VMEM((_SUBLANES, _LANES), jnp.float32)],
        ),
        compiler_params=pltpu.CompilerParams(
            dimension_semantics=("parallel", "arbitrary")),
    )(n_arr, yp, yt)

    # Tiny epilogue: cross-lane/cross-chunk reduction + algebraic fold of sum(at).
    n_pos = jnp.sum(pos_part)
    sum_focal = jnp.sum(foc_part)
    # sum(at) = alpha*(n - n_pos) + (1 - alpha)*n_pos
    sum_at = alpha * n + (1.0 - 2.0 * alpha) * n_pos
    inv_n = 1.0 / float(n)
    # mean over the broadcast (N, N) matrix == mean(at) * mean(focal)
    return (sum_at * inv_n) * (sum_focal * inv_n)


def focal_loss_ref(y_pred, y_true, alpha=0.25, gamma=2.0):
    """Pure-JAX reference mirroring the PyTorch forward (incl. its broadcasting)."""
    yp = jnp.reshape(y_pred, (-1, 1)).astype(jnp.float32)
    yt = jnp.reshape(y_true, (-1, 1)).astype(jnp.float32)
    bce = jnp.maximum(yp, 0.0) - yp * yt + jnp.log1p(jnp.exp(-jnp.abs(yp)))   # (N,1)
    at = jnp.where(jnp.reshape(yt, (-1,)).astype(jnp.int32) == 1,
                   1.0 - alpha, alpha)                                        # (N,)
    pt = jnp.exp(-bce)
    f_loss = at * (1.0 - pt) ** gamma * bce                                   # (N,N)
    return jnp.mean(f_loss)


if __name__ == "__main__":
    key = jax.random.PRNGKey(0)
    k1, k2 = jax.random.split(key)

    N = 32
    y_pred = jax.random.normal(k1, (N, 1), dtype=jnp.float32)               # logits
    y_true = jax.random.bernoulli(k2, 0.5, (N,)).astype(jnp.float32)         # binary labels

    loss = focal_loss_pallas(y_pred, y_true, alpha=0.25, gamma=2.0)
    loss = jax.block_until_ready(loss)

    ref = focal_loss_ref(y_pred, y_true, alpha=0.25, gamma=2.0)
    assert jnp.allclose(loss, ref, rtol=5e-3, atol=1e-6), (loss, ref)

    print("KERNEL_OK")
</pallas_src>

<mosaic_0001>
module attributes {stable_mosaic.version = 11 : i64} {
  func.func @_focal_loss_kernel(%arg0: i32, %arg1: i32, %arg2: memref<1xi32, #tpu.memory_space<smem>>, %arg3: memref<8x128xf32, #tpu.memory_space<vmem>>, %arg4: memref<8x128xf32, #tpu.memory_space<vmem>>, %arg5: memref<1x8x128xf32, #tpu.memory_space<vmem>>, %arg6: memref<1x8x128xf32, #tpu.memory_space<vmem>>, %arg7: memref<8x128xf32, #tpu.memory_space<vmem>>, %arg8: memref<8x128xf32, #tpu.memory_space<vmem>>) attributes {dimension_semantics = [#tpu.dimension_semantics<parallel>, #tpu.dimension_semantics<arbitrary>], iteration_bounds = array<i64: 2, 1>, scalar_prefetch = 1 : i64, scratch_operands = 2 : i64, tpu.core_type = #tpu.core_type<tc>, window_params = [{transform_indices = @transform_0, window_bounds = array<i64: 8, 128>}, {transform_indices = @transform_1, window_bounds = array<i64: 8, 128>}, {transform_indices = @transform_2, window_bounds = array<i64: 1, 8, 128>}, {transform_indices = @transform_3, window_bounds = array<i64: 1, 8, 128>}]} {
    %c0_i32 = arith.constant 0 : i32
    %0 = arith.cmpi eq, %arg1, %c0_i32 : i32
    %1 = arith.extui %0 : i1 to i32
    %c0_i32_0 = arith.constant 0 : i32
    %2 = arith.cmpi ne, %1, %c0_i32_0 : i32
    scf.if %2 {
      %cst_28 = arith.constant 0.000000e+00 : f32
      %65 = vector.broadcast %cst_28 : f32 to vector<8x128xf32>
      %c0_29 = arith.constant 0 : index
      %c0_30 = arith.constant 0 : index
      %66 = vector.load %arg7[%c0_29, %c0_30] : memref<8x128xf32, #tpu.memory_space<vmem>>, vector<8x128xf32>
      tpu.vector_store %arg7[%c0_29, %c0_30], %65 {strides = array<i32>} : memref<8x128xf32, #tpu.memory_space<vmem>>, vector<8x128xf32>,
      %cst_31 = arith.constant 0.000000e+00 : f32
      %67 = vector.broadcast %cst_31 : f32 to vector<8x128xf32>
      %c0_32 = arith.constant 0 : index
      %c0_33 = arith.constant 0 : index
      %68 = vector.load %arg8[%c0_32, %c0_33] : memref<8x128xf32, #tpu.memory_space<vmem>>, vector<8x128xf32>
      tpu.vector_store %arg8[%c0_32, %c0_33], %67 {strides = array<i32>} : memref<8x128xf32, #tpu.memory_space<vmem>>, vector<8x128xf32>,
    } else {
    }
    %c0 = arith.constant 0 : index
    %c0_1 = arith.constant 0 : index
    %3 = vector.load %arg3[%c0, %c0_1] : memref<8x128xf32, #tpu.memory_space<vmem>>, vector<8x128xf32>
    %c0_2 = arith.constant 0 : index
    %c0_3 = arith.constant 0 : index
    %4 = vector.load %arg4[%c0_2, %c0_3] : memref<8x128xf32, #tpu.memory_space<vmem>>, vector<8x128xf32>
    %c0_4 = arith.constant 0 : index
    %c0_5 = arith.constant 0 : index
    %5 = vector.load %arg4[%c0_4, %c0_5] : memref<8x128xf32, #tpu.memory_space<vmem>>, vector<8x128xf32>
    %6 = arith.fptosi %5 : vector<8x128xf32> to vector<8x128xi32>
    %c0_6 = arith.constant 0 : index
    %7 = memref.load %arg2[%c0_6] : memref<1xi32, #tpu.memory_space<smem>>
    %c1_i32 = arith.constant 1 : i32
    %8 = arith.muli %arg0, %c1_i32 : i32
    %9 = arith.addi %8, %arg1 : i32
    %c8_i32 = arith.constant 8 : i32
    %10 = arith.muli %9, %c8_i32 : i32
    %11 = tpu.iota {dimensions = array<i32: 0>} : vector<8x128xi32>
    %12 = vector.broadcast %10 : i32 to vector<8x128xi32>
    %13 = arith.addi %12, %11 : vector<8x128xi32>
    %14 = tpu.iota {dimensions = array<i32: 1>} : vector<8x128xi32>
    %c128_i32 = arith.constant 128 : i32
    %15 = vector.broadcast %c128_i32 : i32 to vector<8x128xi32>
    %16 = arith.muli %13, %15 : vector<8x128xi32>
    %17 = arith.addi %16, %14 : vector<8x128xi32>
    %18 = vector.broadcast %7 : i32 to vector<8x128xi32>
    %19 = arith.cmpi slt, %17, %18 : vector<8x128xi32>
    %20 = math.absf %3 : vector<8x128xf32>
    %cst = arith.constant 0.000000e+00 : f32
    %21 = vector.broadcast %cst : f32 to vector<8x128xf32>
    %22 = arith.subf %21, %20 : vector<8x128xf32>
    %23 = math.exp %22 : vector<8x128xf32>
    %cst_7 = arith.constant 0.000000e+00 : f32
    %24 = vector.broadcast %cst_7 : f32 to vector<8x128xf32>
    %25 = arith.maximumf %3, %24 : vector<8x128xf32>
    %26 = arith.mulf %3, %4 : vector<8x128xf32>
    %27 = arith.subf %25, %26 : vector<8x128xf32>
    %28 = math.log1p %23 : vector<8x128xf32>
    %29 = arith.addf %27, %28 : vector<8x128xf32>
    %cst_8 = arith.constant 1.000000e+00 : f32
    %30 = vector.broadcast %cst_8 : f32 to vector<8x128xf32>
    %31 = arith.addf %30, %23 : vector<8x128xf32>
    %32 = tpu.reciprocal %31 {approx = true} : vector<8x128xf32> -> vector<8x128xf32>
    %cst_9 = arith.constant 0.000000e+00 : f32
    %33 = vector.broadcast %cst_9 : f32 to vector<8x128xf32>
    %34 = arith.cmpf oge, %3, %33 : vector<8x128xf32>
    %35 = arith.mulf %23, %32 : vector<8x128xf32>
    %36 = arith.select %34, %32, %35 : vector<8x128xi1>, vector<8x128xf32>
    %c1_i32_10 = arith.constant 1 : i32
    %37 = vector.broadcast %c1_i32_10 : i32 to vector<8x128xi32>
    %38 = arith.cmpi eq, %6, %37 : vector<8x128xi32>
    %cst_11 = arith.constant 1.000000e+00 : f32
    %39 = vector.broadcast %cst_11 : f32 to vector<8x128xf32>
    %40 = arith.subf %39, %36 : vector<8x128xf32>
    %41 = arith.select %38, %36, %40 : vector<8x128xi1>, vector<8x128xf32>
    %cst_12 = arith.constant 1.000000e+00 : f32
    %42 = vector.broadcast %cst_12 : f32 to vector<8x128xf32>
    %43 = arith.subf %42, %41 : vector<8x128xf32>
    %44 = arith.mulf %43, %43 : vector<8x128xf32>
    %45 = arith.mulf %44, %29 : vector<8x128xf32>
    %c0_13 = arith.constant 0 : index
    %c0_14 = arith.constant 0 : index
    %46 = vector.load %arg8[%c0_13, %c0_14] : memref<8x128xf32, #tpu.memory_space<vmem>>, vector<8x128xf32>
    %cst_15 = arith.constant 0.000000e+00 : f32
    %47 = vector.broadcast %cst_15 : f32 to vector<8x128xf32>
    %48 = arith.select %19, %45, %47 : vector<8x128xi1>, vector<8x128xf32>
    %49 = vector.shape_cast %48 : vector<8x128xf32> to vector<1x8x128xf32>
    %cst_16 = arith.constant dense<0.000000e+00> : vector<8x128xf32>
    %50 = vector.multi_reduction <add>, %49, %cst_16 [0] : vector<1x8x128xf32> to vector<8x128xf32>
    %51 = arith.addf %46, %50 : vector<8x128xf32>
    %c0_17 = arith.constant 0 : index
    %c0_18 = arith.constant 0 : index
    %52 = vector.load %arg8[%c0_17, %c0_18] : memref<8x128xf32, #tpu.memory_space<vmem>>, vector<8x128xf32>
    tpu.vector_store %arg8[%c0_17, %c0_18], %51 {strides = array<i32>} : memref<8x128xf32, #tpu.memory_space<vmem>>, vector<8x128xf32>,
    %c0_19 = arith.constant 0 : index
    %c0_20 = arith.constant 0 : index
    %53 = vector.load %arg7[%c0_19, %c0_20] : memref<8x128xf32, #tpu.memory_space<vmem>>, vector<8x128xf32>
    %54 = arith.andi %19, %38 : vector<8x128xi1>
    %cst_21 = arith.constant 1.000000e+00 : f32
    %cst_22 = arith.constant 0.000000e+00 : f32
    %55 = vector.broadcast %cst_21 : f32 to vector<8x128xf32>
    %56 = vector.broadcast %cst_22 : f32 to vector<8x128xf32>
    %57 = arith.select %54, %55, %56 : vector<8x128xi1>, vector<8x128xf32>
    %58 = vector.shape_cast %57 : vector<8x128xf32> to vector<1x8x128xf32>
    %cst_23 = arith.constant dense<0.000000e+00> : vector<8x128xf32>
    %59 = vector.multi_reduction <add>, %58, %cst_23 [0] : vector<1x8x128xf32> to vector<8x128xf32>
    %60 = arith.addf %53, %59 : vector<8x128xf32>
    %c0_24 = arith.constant 0 : index
    %c0_25 = arith.constant 0 : index
    %61 = vector.load %arg7[%c0_24, %c0_25] : memref<8x128xf32, #tpu.memory_space<vmem>>, vector<8x128xf32>
    tpu.vector_store %arg7[%c0_24, %c0_25], %60 {strides = array<i32>} : memref<8x128xf32, #tpu.memory_space<vmem>>, vector<8x128xf32>,
    %c0_i32_26 = arith.constant 0 : i32
    %62 = arith.cmpi eq, %arg1, %c0_i32_26 : i32
    %63 = arith.extui %62 : i1 to i32
    %c0_i32_27 = arith.constant 0 : i32
    %64 = arith.cmpi ne, %63, %c0_i32_27 : i32
    scf.if %64 {
      %c0_28 = arith.constant 0 : index
      %c0_29 = arith.constant 0 : index
      %65 = vector.load %arg7[%c0_28, %c0_29] : memref<8x128xf32, #tpu.memory_space<vmem>>, vector<8x128xf32>
      %c0_30 = arith.constant 0 : index
      %c0_31 = arith.constant 0 : index
      %c0_32 = arith.constant 0 : index
      %66 = vector.load %arg5[%c0_30, %c0_31, %c0_32] : memref<1x8x128xf32, #tpu.memory_space<vmem>>, vector<1x8x128xf32>
      %67 = vector.shape_cast %66 : vector<1x8x128xf32> to vector<8x128xf32>
      %68 = vector.shape_cast %65 : vector<8x128xf32> to vector<1x8x128xf32>
      tpu.vector_store %arg5[%c0_30, %c0_31, %c0_32], %68 {strides = array<i32>} : memref<1x8x128xf32, #tpu.memory_space<vmem>>, vector<1x8x128xf32>,
      %c0_33 = arith.constant 0 : index
      %c0_34 = arith.constant 0 : index
      %69 = vector.load %arg8[%c0_33, %c0_34] : memref<8x128xf32, #tpu.memory_space<vmem>>, vector<8x128xf32>
      %c0_35 = arith.constant 0 : index
      %c0_36 = arith.constant 0 : index
      %c0_37 = arith.constant 0 : index
      %70 = vector.load %arg6[%c0_35, %c0_36, %c0_37] : memref<1x8x128xf32, #tpu.memory_space<vmem>>, vector<1x8x128xf32>
      %71 = vector.shape_cast %70 : vector<1x8x128xf32> to vector<8x128xf32>
      %72 = vector.shape_cast %69 : vector<8x128xf32> to vector<1x8x128xf32>
      tpu.vector_store %arg6[%c0_35, %c0_36, %c0_37], %72 {strides = array<i32>} : memref<1x8x128xf32, #tpu.memory_space<vmem>>, vector<1x8x128xf32>,
    } else {
    }
    return
  }
  func.func @transform_0(%arg0: i32, %arg1: i32, %arg2: memref<1xi32, #tpu.memory_space<smem>>) -> (i32, i32) {
    %c1_i32 = arith.constant 1 : i32
    %0 = arith.muli %arg0, %c1_i32 : i32
    %1 = arith.addi %0, %arg1 : i32
    %c0_i32 = arith.constant 0 : i32
    %c0_i32_0 = arith.constant 0 : i32
    return %1, %c0_i32 : i32, i32
  }
  func.func @transform_1(%arg0: i32, %arg1: i32, %arg2: memref<1xi32, #tpu.memory_space<smem>>) -> (i32, i32) {
    %c1_i32 = arith.constant 1 : i32
    %0 = arith.muli %arg0, %c1_i32 : i32
    %1 = arith.addi %0, %arg1 : i32
    %c0_i32 = arith.constant 0 : i32
    %c0_i32_0 = arith.constant 0 : i32
    return %1, %c0_i32 : i32, i32
  }
  func.func @transform_2(%arg0: i32, %arg1: i32, %arg2: memref<1xi32, #tpu.memory_space<smem>>) -> (i32, i32, i32) {
    %c0_i32 = arith.constant 0 : i32
    %c0_i32_0 = arith.constant 0 : i32
    %c0_i32_1 = arith.constant 0 : i32
    return %arg0, %c0_i32, %c0_i32_0 : i32, i32, i32
  }
  func.func @transform_3(%arg0: i32, %arg1: i32, %arg2: memref<1xi32, #tpu.memory_space<smem>>) -> (i32, i32, i32) {
    %c0_i32 = arith.constant 0 : i32
    %c0_i32_0 = arith.constant 0 : i32
    %c0_i32_1 = arith.constant 0 : i32
    return %arg0, %c0_i32, %c0_i32_0 : i32, i32, i32
  }
}

</mosaic_0001>

<bundles_post_ra>
// kernel: tpu_custom_call.1
= control target key start
LH: loop header
LB: loop body
LE: loop exit
PB: predicated region body
PF: predicated region fallthrough
CT: control target
= control target key end

     0   :  { %s1081_s0 = inlined_call_operand.<no memory space> [shape: s32[1], index: 0, kind: input, shape index: {}]   ;;  %s1082_s1 = inlined_call_operand.hbm [shape: f32[16,128], index: 1, kind: input, shape index: {}]   ;;  %s1083_s2 = inlined_call_operand.hbm [shape: f32[16,128], index: 2, kind: input, shape index: {}]   ;;  %s1084_s3 = inlined_call_operand.hbm [shape: f32[2,8,128], index: 3, kind: output, shape index: {0}]   ;;  %s1085_s4 = inlined_call_operand.hbm [shape: f32[2,8,128], index: 4, kind: output, shape index: {1}]  }
   0x1   :  { %10 = sst [smem:[#allocation5]] %s1081_s0 }
   0x2   :  { %11 = vsyncpa [#allocation7], 0 }
   0x3   :  { %13 = vsyncpa [#allocation7 + $0x1], 0 }
   0x4   :  { %14 = vsyncpa [#allocation10], 0 }
   0x5   :  { %16 = vsyncpa [#allocation10 + $0x1], 0 }
   0x6   :  { %17 = vsyncpa [#allocation8], 0 }
   0x7   :  { %19 = vsyncpa [#allocation8 + $0x1], 0 }
   0x8   :  { %20 = vsyncpa [#allocation13], 0 }
   0x9   :  { %22 = vsyncpa [#allocation13 + $0x1], 0  ;;  %s805_s17 = smov 0   ;;  %s807_s18 = smov 0  }
   0xa   :  { %s809_s19 = smov 0   ;;  %s811_s20 = smov 0  }
   0xb   :  { %s813_s21 = smov 0   ;;  %s815_s22 = smov 0  }
   0xc LB: > { %s491_s0 = sadd.s32 4294967295, %s770_s22   ;;  %s492_s23 = sadd.s32 4294967294, %s770_s22   ;;  %s770_s22 = sphi %s815_s22, %s28_s22   ;;  %s766_s21 = sphi %s813_s21, %s1107_s21   ;;  %s762_s20 = sphi %s811_s20, %s1106_s20   ;;  %s758_s19 = sphi %s809_s19, %s1105_s19   ;;  %s754_s18 = sphi %s807_s18, %s1104_s18   ;;  %s750_s17 = sphi %s805_s17, %s1103_s17  }
   0xd   : > { %s40_s24 = sadd.s32 1, %s766_s21  ;;  %s49_s25 = sadd.s32 1, %s758_s19 }
   0xe   : > { %p42_p0 = scmp.ge.s32.totalorder %s40_s24, 2  ;;  %p56_p1 = scmp.ne.s32.totalorder %s758_s19, %s754_s18 }
   0xf   : > { %p57_p2 = scmp.eq.s32.totalorder %s770_s22, 0  ;;  %p62_p3 = scmp.ne.s32.totalorder %s754_s18, %s750_s17 }
  0x10   : > { %s1109_s24 = smov (%p42_p0, %s40_s24), 0  ;;  %p63_p5 = scmp.eq.s32.totalorder %s491_s0, 0 }
  0x11   : > { %p846_p4 = por %p57_p2, %p56_p1  ;;  %s46_s27 = ssub.s32 %s766_s21, %s1109_s24 }
  0x12   : > { %p114_p6 = scmp.eq.s32.totalorder %s491_s0, 1  ;;  %p47_p7 = scmp.eq.s32.totalorder %s46_s27, 0 }
  0x13   : > { %p852_p8 = por %p63_p5, %p62_p3  ;;  %p120_p10 = scmp.eq.s32.totalorder %s492_s23, 1 }
  0x14   : > { %p856_p9 = por %p114_p6, %p56_p1  ;;  %p535_p13 = scmp.lt.s32.totalorder %s770_s22, 2 }
  0x15   : > { %s1089_s28 = scalar_select %p852_p8, 1, 0 }
  0x16   : > { %s1090_s29 = scalar_select %p856_p9, 1, 0 }
  0x17   : > { %s861_s30 = scalar_select %p47_p7, %s758_s19, %s49_s25  }
  0x18   : > { %p863_p11 = por %p120_p10, %p62_p3  ;;  %s870_s6 = sand.u32 1, %s758_s19  }
  0x19   : > { %s495_s7 = sshll.u32 %s870_s6, 3  ;;  %s496_s8 = sshll.u32 %s766_s21, 7 }
  0x1a   : > { %s1091_s5 = scalar_select %p863_p11, 1, 0 }
  0x1b   : > { %s879_s11 = scalar_lea.hbm %s1082_s1, %s496_s8  ;;  %s170_s12 = scalar_lea.vmem [#allocation6], %s495_s7 }
  0x1c   : > { %s178_s13 = sshll.u32 %s170_s12, 4  ;;  %p887_p0 = pnand %p535_p13, %p846_p4  ;;  %s883_s13 = int_to_ptr.vmem [resolvable:$true] %s178_s13 }
  0x1d   : > { %s167_s15 = scalar_lea.sflag [#allocation7], %s870_s6  ;;  %s592_s16 = scalar_lea.hbm %s879_s11, 128 }
  0x1e   : > { %p593_p3 = scmp.ne.s32.totalorder %s879_s11, %s592_s16  ;;  %p594_p5 = pneg %p887_p0 }
  0x1f   : > { %s597_s25 = scalar_lea.hbm %s1082_s1, 256  ;;  %p598_p4 = scmp.lt.u32.totalorder %s879_s11, %s1082_s1 }
  0x20   : > { %p595_p6 = pnand %p594_p5, %p593_p3  ;;  %p599_p10 = scmp.lt.u32.totalorder %s597_s25, %s592_s16 }
  0x21   : > { %p601_p12 = scmp.lt.u32.totalorder %s592_s16, %s879_s11 }
  0x22   : > { %p596_p7 = pneg %p595_p6  ;;  %p600_p13 = por %p599_p10, %p598_p4 }
  0x24   : > { %p602_p1 = por %p601_p12, %p600_p13 }
  0x26   : > { %p603_p2 = pnand %p602_p1, %p596_p7 }
  0x28   : > { %606 = shalt.err (!%p603_p2)
}
  0x29   : > { %s607_s9 = scalar_lea.vmem %s883_s13, 128  ;;  %s772_s10 = smov [#allocation6]  }
  0x2a   : > { %p608_p3 = scmp.ne.s32.totalorder %s883_s13, %s607_s9  ;;  %s612_s12 = sshll.u32 %s772_s10, 4  ;;  %s613_s12 = int_to_ptr.vmem [resolvable:$false] %s612_s12 }
  0x2b   : > { %s614_s0 = scalar_lea.vmem %s613_s12, 256  ;;  %p615_p9 = scmp.lt.s32.totalorder %s883_s13, %s613_s12 }
  0x2c   : > { %p610_p6 = pnand %p608_p3, %p594_p5  ;;  %p616_p4 = scmp.lt.s32.totalorder %s614_s0, %s607_s9 }
  0x2e   : > { %p611_p11 = pneg %p610_p6  ;;  %p617_p10 = por %p616_p4, %p615_p9 }
  0x30   : > { %p618_p12 = pnand %p617_p10, %p611_p11 }
  0x32   : > { %621 = shalt.err (!%p618_p12)
}
  0x33   : > { %524 = dma.hbm_to_vmem [thread:$0]  (!%p887_p0), %s879_s11, 128, %s883_s13, %s167_s15  }
  0x34   : > { %p1093_p1 = scmp.lt.s32.totalorder %s770_s22, 3  ;;  %p1094_p2 = scmp.ge.s32.totalorder %s770_s22, 1 }
  0x35   : > { %s932_s26 = scalar_lea.hbm %s1083_s2, %s496_s8  ;;  %s189_s27 = scalar_lea.vmem [#allocation9], %s495_s7 }
  0x36   : > { %p923_p7 = pnand %p1094_p2, %p1093_p1  ;;  %s197_s9 = sshll.u32 %s189_s27, 4  ;;  %s198_s9 = int_to_ptr.vmem [resolvable:$true] %s197_s9 }
  0x37   : > { %s186_s11 = scalar_lea.sflag [#allocation10], %s870_s6  ;;  %s622_s13 = scalar_lea.hbm %s932_s26, 128 }
  0x38   : > { %s1095_s16 = scalar_select %p923_p7, 1, 0 }
  0x39   : > { %p623_p9 = scmp.ne.s32.totalorder %s932_s26, %s622_s13  ;;  %s627_s8 = scalar_lea.hbm %s1083_s2, 256 }
  0x3a   : > { %p628_p3 = scmp.lt.u32.totalorder %s932_s26, %s1083_s2  ;;  %p629_p6 = scmp.lt.u32.totalorder %s627_s8, %s622_s13 }
  0x3b   : > { %p625_p11 = pnand %p623_p9, %p594_p5  ;;  %p631_p10 = scmp.lt.u32.totalorder %s622_s13, %s932_s26 }
  0x3c   : > { %p630_p4 = por %p629_p6, %p628_p3 }
  0x3d   : > { %p626_p13 = pneg %p625_p11 }
  0x3e   : > { %p632_p12 = por %p631_p10, %p630_p4 }
  0x40   : > { %p633_p1 = pnand %p632_p12, %p626_p13 }
  0x42   : > { %636 = shalt.err (!%p633_p1)
}
  0x43   : > { %s637_s6 = scalar_lea.vmem %s198_s9, 128  ;;  %s773_s7 = smov [#allocation9]  }
  0x44   : > { %p638_p2 = scmp.ne.s32.totalorder %s198_s9, %s637_s6  ;;  %s642_s23 = sshll.u32 %s773_s7, 4  ;;  %s643_s23 = int_to_ptr.vmem [resolvable:$false] %s642_s23 }
  0x45   : > { %s644_s25 = scalar_lea.vmem %s643_s23, 256  ;;  %p645_p8 = scmp.lt.s32.totalorder %s198_s9, %s643_s23 }
  0x46   : > { %p640_p9 = pnand %p638_p2, %p594_p5  ;;  %p646_p7 = scmp.lt.s32.totalorder %s644_s25, %s637_s6 }
  0x48   : > { %p641_p11 = pneg %p640_p9  ;;  %p647_p3 = por %p646_p7, %p645_p8 }
  0x4a   : > { %p648_p6 = pnand %p647_p3, %p641_p11 }
  0x4c   : > { %651 = shalt.err (!%p648_p6)
}
  0x4d   : > { %527 = dma.hbm_to_vmem [thread:$0]  (!%p887_p0), %s932_s26, 128, %s198_s9, %s186_s11  }
  0x4e   : > { %p1096_p13 = scmp.ne.s32.totalorder %s1095_s16, 0 }
  0x4f   : > { %s959_s27 = sand.u32 (!%p1096_p13), 1, %s754_s18   ;;  %p1097_p8 = scmp.ne.s32.totalorder (!%p1096_p13), %s1089_s28, 0 }
  0x50   : > { %206 = sbr.rel (%p1096_p13) target bundleno = 157 (0x9d), region = 28  ;;  %s962_s13 = sshll.u32 (!%p1096_p13), %s959_s27, 3 }
  0x51   : > { %s209_s15 = scalar_lea.sflag (!%p1096_p13), [#allocation7], %s959_s27  ;;  %s212_s10 = scalar_lea.vmem (!%p1096_p13), [#allocation6], %s962_s13 }
  0x57   : > { %733 = dma.done.wait (%p1097_p8), %s209_s15, 128  }
  0x58   : > { %735 = vsyncadd (%p1097_p8), %s209_s15, 4294967168  ;;  %s218_s14 = scalar_lea.sflag [#allocation10], %s959_s27  ;;  %s221_s16 = scalar_lea.vmem [#allocation9], %s962_s13 }
  0x59   : > { %737 = dma.done.wait (%p1097_p8), %s218_s14, 128  }
  0x5a   : > { %739 = vsyncadd (%p1097_p8), %s218_s14, 4294967168  ;;  %s504_s26 = sshll.u32 %s762_s20, 3  ;;  %v268_v0 = vlaneseq  ;;  %s265_s9 = sld [smem:[#allocation5]]  ;;  %v977_v6 = vld [vmem:[%s212_s10] sm:$0xff]  ;;  %v263_v7 = vld [vmem:[%s221_s16] sm:$0xff]  ;;  %v774_v16 = vmov 0.0  }
  0x5b   : > { %v270_v1 = vstv %s504_s26  ;;  %v511_v9 = vtrunc.f32 %v263_v7  ;;  %v278_v11 = vand.u32 2147483647, %v977_v6  ;;  %s246_s28 = scalar_lea.vmem [#allocation11], %s962_s13  ;;  %s507_s8 = sshll.u32 %s762_s20, 7 }
  0x5c   : > { %v269_v2 = vshrl.u32 %v268_v0, 7  ;;  %v273_v4 = vand.u32 127, %v268_v0  ;;  %s343_s11 = sshll.u32 %s246_s28, 4  ;;  %s996_s6 = scalar_lea.hbm %s1084_s3, %s507_s8  ;;  %s986_s11 = int_to_ptr.vmem [resolvable:$true] %s343_s11 }
  0x5d   : > { %v512_v12 = vcvt.f32.s32 %v511_v9  ;;  %v279_v14 = vsub.f32 0.0, %v278_v11  ;;  %s325_s7 = scalar_lea.sflag [#allocation8], %s959_s27  ;;  %s652_s23 = scalar_lea.vmem %s986_s11, 128 }
  0x5e   : > { %v271_v3 = vadd.s32 %v270_v1, %v269_v2  ;;  %p653_p0 = scmp.ne.s32.totalorder %s986_s11, %s652_s23  ;;  %p1100_p5 = scmp.ne.s32.totalorder %s1090_s29, 0 }
  0x5f   : > { %v280_v15 = vmul.f32 1.442695, %v279_v14  ;;  %vm300_vm1 = vcmp.eq.s32.totalorder %v512_v12, 1  ;;  %s775_s25 = smov [#allocation11]  }
  0x60   : > { %v274_v5 = vmul.u32 128, %v271_v3  ;;  %v276_v8 = vstv %s265_s9  ;;  %p654_p7 = pnand %p653_p0, %p1100_p5  ;;  %s656_s15 = sshll.u32 %s775_s25, 4  ;;  %s657_s15 = int_to_ptr.vmem [resolvable:$false] %s656_s15 }
  0x61   : > { %586 = vpow2.f32 %v280_v15  ;;  %s658_s10 = scalar_lea.vmem %s657_s15, 256  ;;  %p659_p10 = scmp.lt.s32.totalorder %s986_s11, %s657_s15 }
  0x62   : > { %v275_v10 = vadd.s32 %v274_v5, %v273_v4  ;;  %p655_p4 = pneg %p654_p7  ;;  %p660_p12 = scmp.lt.s32.totalorder %s658_s10, %s652_s23 }
  0x64   : > { %vm981_vm0 = vcmp.lt.s32.totalorder %v275_v10, %v276_v8  ;;  %p661_p1 = por %p660_p12, %p659_p10 }
  0x65   : > { %vm312_vm2 = vmand %vm981_vm0, %vm300_vm1 }
  0x66   : > { %v313_v17 = vsel %vm312_vm2, 1.0, %v774_v16  ;;  %p662_p2 = pnand %p661_p1, %p655_p4 }
  0x67   : > { %321 = vst [vmem:[%s246_s28] sm:$0xff] %v313_v17 }
  0x68   : > { %665 = shalt.err (!%p662_p2)
}
  0x69   : > { %s666_s14 = scalar_lea.hbm %s996_s6, 128  ;;  %s670_s9 = scalar_lea.hbm %s1084_s3, 256 }
  0x6a   : > { %p667_p9 = scmp.ne.s32.totalorder %s996_s6, %s666_s14  ;;  %p671_p6 = scmp.lt.u32.totalorder %s996_s6, %s1084_s3 }
  0x6b   : > { %p672_p13 = scmp.lt.u32.totalorder %s670_s9, %s666_s14  ;;  %p674_p0 = scmp.lt.u32.totalorder %s666_s14, %s996_s6 }
  0x6c   : > { %p668_p11 = pnand %p667_p9, %p1100_p5 }
  0x6d   : > { %p673_p8 = por %p672_p13, %p671_p6 }
  0x6e   : > { %p669_p3 = pneg %p668_p11 }
  0x6f   : > { %p675_p7 = por %p674_p0, %p673_p8 }
  0x71   : > { %p676_p4 = pnand %p675_p7, %p669_p3 }
  0x73   : > { %679 = shalt.err (!%p676_p4)
}
  0x74   : > { %517 = dma.vmem_to_hbm [thread:$0]  (%p1100_p5), %s986_s11, 128, %s996_s6, %s325_s7   ;;  %v587_v18 = vpop.eup %586  ;;  %v283_v23 = vmul.f32 %v263_v7, %v977_v6  ;;  %v282_v24 = vmax.f32 %v977_v6, 0.0  ;;  %vm297_vm3 = vcmp.ge.f32.partialorder %v977_v6, 0.0 }
  0x75   : > { %v285_v19 = vadd.f32 1.0, %v587_v18  ;;  %v288_v20 = vmul.f32 -0.5, %v587_v18  ;;  %v291_v22 = vand.u32 2147483647, %v587_v18  ;;  %s253_s11 = scalar_lea.vmem [#allocation12], %s962_s13  ;;  %s1032_s23 = scalar_lea.hbm %s1085_s4, %s507_s8 }
  0x76   : > { %v284_v31 = vsub.f32 %v282_v24, %v283_v23  ;;  %s356_s0 = sshll.u32 %s253_s11, 4  ;;  %s330_s25 = scalar_lea.sflag [#allocation13], %s959_s27  ;;  %s1025_s0 = int_to_ptr.vmem [resolvable:$true] %s356_s0 }
  0x77   : > { %588 = vrcp.f32 %v285_v19  ;;  %v289_v21 = vadd.f32 1.0, %v288_v20  ;;  %vm292_vm4 = vcmp.lt.f32.partialorder %v291_v22, 0.0004427343  ;;  %s680_s13 = scalar_lea.vmem %s1025_s0, 128  ;;  %s776_s15 = smov [#allocation12]  }
  0x78   : > { %590 = vlog2.f32 %v285_v19  ;;  %p681_p10 = scmp.ne.s32.totalorder %s1025_s0, %s680_s13  ;;  %s684_s20 = sshll.u32 %s776_s15, 4  ;;  %s685_s20 = int_to_ptr.vmem [resolvable:$false] %s684_s20 }
  0x79   : > { %v290_v26 = vmul.f32 %v587_v18, %v289_v21  ;;  %s686_s10 = scalar_lea.vmem %s685_s20, 256  ;;  %p687_p2 = scmp.lt.s32.totalorder %s1025_s0, %s685_s20 }
  0x7a   : > { %p682_p12 = pnand %p681_p10, %p1100_p5  ;;  %p688_p9 = scmp.lt.s32.totalorder %s686_s10, %s680_s13 }
  0x7c   : > { %p683_p1 = pneg %p682_p12  ;;  %p689_p11 = por %p688_p9, %p687_p2 }
  0x7e   : > { %p690_p3 = pnand %p689_p11, %p683_p1 }
  0x81   : > { %v589_v25 = vpop.eup %588 }
  0x82   : > { %v591_v27 = vpop.eup %590  ;;  %v298_v28 = vmul.f32 %v589_v25, %v587_v18 }
  0x83   : > { %v287_v29 = vmul.f32 0.6931472, %v591_v27 }
  0x84   : > { %v299_v30 = vsel %vm297_vm3, %v589_v25, %v298_v28 }
  0x85   : > { %v301_v32 = vsub.f32 1.0, %v299_v30  ;;  %v293_v33 = vsel %vm292_vm4, %v290_v26, %v287_v29 }
  0x86   : > { %v294_v35 = vadd.f32 %v293_v33, %v284_v31 }
  0x87   : > { %v302_v34 = vsel %vm300_vm1, %v299_v30, %v301_v32 }
  0x88   : > { %v303_v36 = vsub.f32 1.0, %v302_v34 }
  0x8a   : > { %v304_v37 = vmul.f32 %v303_v36, %v303_v36 }
  0x8c   : > { %v305_v38 = vmul.f32 %v304_v37, %v294_v35 }
  0x8e   : > { %v307_v39 = vsel %vm981_vm0, %v305_v38, 0.0 }
  0x8f   : > { %323 = vst [vmem:[%s253_s11] sm:$0xff] %v307_v39 }
  0x90   : > { %693 = shalt.err (!%p690_p3)
}
  0x91   : > { %s694_s27 = scalar_lea.hbm %s1032_s23, 128  ;;  %s698_s16 = scalar_lea.hbm %s1085_s4, 256 }
  0x92   : > { %p695_p6 = scmp.ne.s32.totalorder %s1032_s23, %s694_s27  ;;  %p699_p0 = scmp.lt.u32.totalorder %s1032_s23, %s1085_s4 }
  0x93   : > { %p700_p7 = scmp.lt.u32.totalorder %s698_s16, %s694_s27  ;;  %p702_p10 = scmp.lt.u32.totalorder %s694_s27, %s1032_s23 }
  0x94   : > { %p696_p13 = pnand %p695_p6, %p1100_p5 }
  0x95   : > { %p701_p4 = por %p700_p7, %p699_p0 }
  0x96   : > { %p697_p8 = pneg %p696_p13 }
  0x97   : > { %p703_p12 = por %p702_p10, %p701_p4 }
  0x99   : > { %p704_p1 = pnand %p703_p12, %p697_p8 }
  0x9b   : > { %707 = shalt.err (!%p704_p1)
}
  0x9c   : > { %518 = dma.vmem_to_hbm [thread:$0]  (%p1100_p5), %s1025_s0, 128, %s1032_s23, %s330_s25  }
  0x9d PF: > { %s368_s28 = sand.u32 1, %s750_s17   ;;  %p1101_p2 = scmp.ne.s32.totalorder %s1091_s5, 0 }
  0x9e   : > { %p1102_p9 = scmp.ge.s32.totalorder %s770_s22, 2  ;;  %s369_s12 = scalar_lea.sflag [#allocation8], %s368_s28 }
  0xa0   : > { %p529_p11 = pnand %p1102_p9, %p1101_p2 }
  0xa2   : > { %741 = dma.done.wait (!%p529_p11), %s369_s12, 128  }
  0xa3   : > { %743 = vsyncadd (!%p529_p11), %s369_s12, 4294967168  ;;  %s378_s11 = scalar_lea.sflag [#allocation13], %s368_s28 }
  0xa4   : > { %745 = dma.done.wait (!%p529_p11), %s378_s11, 128  }
  0xa5   : > { %747 = vsyncadd (!%p529_p11), %s378_s11, 4294967168  ;;  %s28_s22 = sadd.s32 1, %s770_s22   ;;  %s1103_s17 = smov %s754_s18 }
  0xa6   : > { %p25_p3 = scmp.ge.s32.totalorder %s28_s22, 4   ;;  %s1104_s18 = smov %s758_s19 }
  0xa7   : > { %s1105_s19 = smov %s861_s30  ;;  %s1106_s20 = smov %s766_s21 }
  0xa8   : > { %s1107_s21 = smov %s1109_s24  ;;  %27 = sbr.rel (!%p25_p3) target bundleno = 12 (0xc), region = 111 }
  0xaf   :  { %383 = vsyncpa [#allocation7], 1 }
  0xb0   :  { %385 = vsyncpa [#allocation7 + $0x1], 1 }
  0xb1   :  { %386 = vsyncpa [#allocation10], 1 }
  0xb2   :  { %388 = vsyncpa [#allocation10 + $0x1], 1 }
  0xb3   :  { %389 = vsyncpa [#allocation8], 1 }
  0xb4   :  { %391 = vsyncpa [#allocation8 + $0x1], 1 }
  0xb5   :  { %392 = vsyncpa [#allocation13], 1 }
  0xb6   :  { %394 = vsyncpa [#allocation13 + $0x1], 1 }

</bundles_post_ra>
